<compile_context>
chip_gen: v7x
topology: tpu7x:2x2x1
jax: 0.10.0
libtpu: 0.0.40
codegen_flags: <defaults>
</compile_context>

<pallas_src>
import jax
import jax.numpy as jnp
from jax.experimental import pallas as pl
from jax.experimental.pallas import tpu as pltpu


def precompute_conv_tables(a_table, n_table, ra, rn):
    """One-time parameter fold: conv(a_table[i], ra) == (a_table @ Ca)[i].

    Ca[j, k] = ra[(k - j) mod D] so that
      (a_table @ Ca)[i, k] = sum_j a_table[i, j] * ra[(k - j) mod D]
                           = ifft(fft(a_table[i]) * fft(ra)).real[k].
    Because the gather a_table[idx] commutes with this linear map, the whole
    FFT-conv path of the forward collapses to a table lookup.
    """
    D = a_table.shape[-1]
    j = jnp.arange(D)[:, None]
    k = jnp.arange(D)[None, :]
    ca = ra[0][(k - j) % D].astype(jnp.float32)          # (D, D)
    cn = rn[0][(k - j) % D].astype(jnp.float32)
    a_conv = a_table.astype(jnp.float32) @ ca            # (Va, D)
    n_conv = n_table.astype(jnp.float32) @ cn            # (Vn, D)
    return a_conv, n_conv


def _rf_kernel(adj_ref, noun_ref,               # SMEM scalar-prefetch: (B, nc) int32
               feat_ref, a_tab_ref, n_tab_ref,  # VMEM: (1,1,D), (Va,D), (Vn,D)
               out_ref,                         # VMEM: (1, 1, nc)
               tgt_ref):                        # VMEM scratch: (nc, D)
    b = pl.program_id(0)
    nc = tgt_ref.shape[0]

    # L2-normalize the image feature (rsqrt -> EUP, scalar-broadcast mul on VPU).
    f = feat_ref[...].reshape(1, -1)                                   # (1, D)
    inv_norm = jax.lax.rsqrt(jnp.sum(f * f, axis=-1, keepdims=True) + 1e-12)
    fn = f * inv_norm

    # In-kernel gather from the VMEM-resident folded tables, indices from SMEM.
    # (nc is tiny; at CLIP scale tile captions and use lax.fori_loop/unroll.)
    for c in range(nc):
        ia = adj_ref[b, c]
        ino = noun_ref[b, c]
        tgt_ref[pl.ds(c, 1), :] = (a_tab_ref[pl.ds(ia, 1), :]
                                   + n_tab_ref[pl.ds(ino, 1), :])

    # dots[c] = <fn, tgt[c]>  (VPU multiply + XLU lane reduce; no MXU needed).
    dots = jnp.sum(tgt_ref[...] * fn, axis=-1)                         # (nc,)
    out_ref[...] = dots.reshape(1, 1, nc)


def rf_forward(batch_feat, adj_idx, noun_idx, a_conv, n_conv):
    """batch_feat: (B, D) raw image features; adj_idx/noun_idx: (B, nc) int32;
    a_conv/n_conv: circulant-folded embedding tables from precompute_conv_tables."""
    bsz, nc = adj_idx.shape
    D = a_conv.shape[-1]

    feat = batch_feat.astype(jnp.float32).reshape(bsz, 1, D)   # 3D so last-two
    adj_idx = adj_idx.astype(jnp.int32)                        # block dims match
    noun_idx = noun_idx.astype(jnp.int32)                      # full array dims.

    cost = pl.CostEstimate(
        flops=3 * bsz * nc * D + 4 * bsz * D,
        transcendentals=bsz,
        bytes_accessed=4 * (bsz * D + a_conv.size + n_conv.size
                            + 2 * bsz * nc + bsz * nc),
    )

    grid_spec = pltpu.PrefetchScalarGridSpec(
        num_scalar_prefetch=2,                 # adj_idx, noun_idx -> SMEM
        grid=(bsz,),
        in_specs=[
            pl.BlockSpec((1, 1, D), lambda b, *_: (b, 0, 0)),          # feat row
            pl.BlockSpec(a_conv.shape, lambda b, *_: (0, 0)),          # resident
            pl.BlockSpec(n_conv.shape, lambda b, *_: (0, 0)),          # resident
        ],
        out_specs=pl.BlockSpec((1, 1, nc), lambda b, *_: (b, 0, 0)),
        scratch_shapes=[pltpu.VMEM((nc, D), jnp.float32)],
    )

    out = pl.pallas_call(
        _rf_kernel,
        out_shape=jax.ShapeDtypeStruct((bsz, 1, nc), jnp.float32),
        grid_spec=grid_spec,
        compiler_params=pltpu.CompilerParams(
            dimension_semantics=("parallel",)),   # batch is embarrassingly parallel
        cost_estimate=cost,
    )(adj_idx, noun_idx, feat, a_conv, n_conv)
    return out.reshape(bsz, nc)


def rf_reference(batch_feat, adj_idx, noun_idx, a_table, n_table, ra, rn):
    # Pure-JAX reference mirroring the PyTorch forward (FFT-based conv).
    feat = batch_feat / jnp.linalg.norm(batch_feat, axis=-1, keepdims=True)
    a_emb = jnp.take(a_table, adj_idx, axis=0)
    n_emb = jnp.take(n_table, noun_idx, axis=0)

    def conv(v, w):
        return jnp.real(jnp.fft.ifft(jnp.fft.fft(v) * jnp.fft.fft(w)))

    tgt = conv(a_emb, ra) + conv(n_emb, rn)          # (B, nc, D)
    return jnp.einsum("bd,bcd->bc", feat, tgt)


if __name__ == "__main__":
    key = jax.random.PRNGKey(0)
    bsz, num_captions, emb_dim = 2, 8, 32
    adjv_num, noun_num = 10, 12
    C, H, W = 3, 16, 16
    k = jax.random.split(key, 8)

    # Deterministic "checkpoint-free" parameters (shapes from __init__).
    a_table = jax.random.normal(k[0], (adjv_num, emb_dim), jnp.float32)
    n_table = jax.random.normal(k[1], (noun_num, emb_dim), jnp.float32)
    ra = jax.random.normal(k[2], (1, emb_dim), jnp.float32)
    rn = jax.random.normal(k[3], (1, emb_dim), jnp.float32)

    # TODO(synk): clip_model.encode_image has no clean Pallas equivalent; it is
    # stubbed with a deterministic linear projection of the flattened NCHW image.
    w_proj = jax.random.normal(k[4], (C * H * W, emb_dim), jnp.float32) * 0.02
    batch_img = jax.random.normal(k[5], (bsz, C, H, W), jnp.float32)
    batch_feat = batch_img.reshape(bsz, -1) @ w_proj                 # (B, D)

    # Tokenized (adj, noun) caption pairs (string parsing / dict lookup is glue).
    adj_idx = jax.random.randint(k[6], (bsz, num_captions), 0, adjv_num)
    noun_idx = jax.random.randint(k[7], (bsz, num_captions), 0, noun_num)

    # One-time parameter fold (would be cached alongside the checkpoint).
    a_conv, n_conv = precompute_conv_tables(a_table, n_table, ra, rn)

    dots = jax.block_until_ready(
        rf_forward(batch_feat, adj_idx, noun_idx, a_conv, n_conv))
    ref = rf_reference(batch_feat, adj_idx, noun_idx, a_table, n_table, ra, rn)

    assert dots.shape == (bsz, num_captions)
    assert jnp.allclose(dots, ref, atol=1e-3, rtol=1e-3)
    print("KERNEL_OK")
</pallas_src>

<mosaic_0001>
module attributes {stable_mosaic.version = 11 : i64} {
  func.func @_rf_kernel(%arg0: i32, %arg1: memref<2x8xi32, #tpu.memory_space<smem>>, %arg2: memref<2x8xi32, #tpu.memory_space<smem>>, %arg3: memref<1x1x32xf32, #tpu.memory_space<vmem>>, %arg4: memref<10x32xf32, #tpu.memory_space<vmem>>, %arg5: memref<12x32xf32, #tpu.memory_space<vmem>>, %arg6: memref<1x1x8xf32, #tpu.memory_space<vmem>>, %arg7: memref<8x32xf32, #tpu.memory_space<vmem>>) attributes {dimension_semantics = [#tpu.dimension_semantics<parallel>], iteration_bounds = array<i64: 2>, scalar_prefetch = 2 : i64, scratch_operands = 1 : i64, tpu.core_type = #tpu.core_type<tc>, window_params = [{transform_indices = @transform_0, window_bounds = array<i64: 1, 1, 32>}, {pipeline_mode = #tpu.pipeline_mode<synchronous>, transform_indices = @transform_1, window_bounds = array<i64: 10, 32>}, {pipeline_mode = #tpu.pipeline_mode<synchronous>, transform_indices = @transform_2, window_bounds = array<i64: 12, 32>}, {transform_indices = @transform_3, window_bounds = array<i64: 1, 1, 8>}]} {
    %c0 = arith.constant 0 : index
    %c0_0 = arith.constant 0 : index
    %c0_1 = arith.constant 0 : index
    %0 = vector.load %arg3[%c0, %c0_0, %c0_1] : memref<1x1x32xf32, #tpu.memory_space<vmem>>, vector<1x1x32xf32>
    %1 = vector.shape_cast %0 : vector<1x1x32xf32> to vector<1x32xf32>
    %2 = arith.mulf %1, %1 : vector<1x32xf32>
    %cst = arith.constant dense<0.000000e+00> : vector<1xf32>
    %3 = vector.multi_reduction <add>, %2, %cst [1] : vector<1x32xf32> to vector<1xf32>
    %4 = vector.shape_cast %3 : vector<1xf32> to vector<1x1xf32>
    %cst_2 = arith.constant 9.99999996E-13 : f32
    %5 = vector.broadcast %cst_2 : f32 to vector<1x1xf32>
    %6 = arith.addf %4, %5 : vector<1x1xf32>
    %7 = math.rsqrt %6 : vector<1x1xf32>
    %8 = vector.broadcast %7 : vector<1x1xf32> to vector<1x32xf32>
    %9 = arith.mulf %1, %8 : vector<1x32xf32>
    %10 = arith.index_cast %arg0 : i32 to index
    %c0_3 = arith.constant 0 : index
    %11 = memref.load %arg1[%10, %c0_3] : memref<2x8xi32, #tpu.memory_space<smem>>
    %12 = arith.index_cast %arg0 : i32 to index
    %c0_4 = arith.constant 0 : index
    %13 = memref.load %arg2[%12, %c0_4] : memref<2x8xi32, #tpu.memory_space<smem>>
    %14 = arith.index_cast %11 : i32 to index
    %c0_5 = arith.constant 0 : index
    %15 = vector.load %arg4[%14, %c0_5] : memref<10x32xf32, #tpu.memory_space<vmem>>, vector<1x32xf32>
    %16 = arith.index_cast %13 : i32 to index
    %c0_6 = arith.constant 0 : index
    %17 = vector.load %arg5[%16, %c0_6] : memref<12x32xf32, #tpu.memory_space<vmem>>, vector<1x32xf32>
    %18 = arith.addf %15, %17 : vector<1x32xf32>
    %c0_7 = arith.constant 0 : index
    %c0_8 = arith.constant 0 : index
    %19 = vector.load %arg7[%c0_7, %c0_8] : memref<8x32xf32, #tpu.memory_space<vmem>>, vector<1x32xf32>
    tpu.vector_store %arg7[%c0_7, %c0_8], %18 {strides = array<i32>} : memref<8x32xf32, #tpu.memory_space<vmem>>, vector<1x32xf32>,
    %20 = arith.index_cast %arg0 : i32 to index
    %c1 = arith.constant 1 : index
    %21 = memref.load %arg1[%20, %c1] : memref<2x8xi32, #tpu.memory_space<smem>>
    %22 = arith.index_cast %arg0 : i32 to index
    %c1_9 = arith.constant 1 : index
    %23 = memref.load %arg2[%22, %c1_9] : memref<2x8xi32, #tpu.memory_space<smem>>
    %24 = arith.index_cast %21 : i32 to index
    %c0_10 = arith.constant 0 : index
    %25 = vector.load %arg4[%24, %c0_10] : memref<10x32xf32, #tpu.memory_space<vmem>>, vector<1x32xf32>
    %26 = arith.index_cast %23 : i32 to index
    %c0_11 = arith.constant 0 : index
    %27 = vector.load %arg5[%26, %c0_11] : memref<12x32xf32, #tpu.memory_space<vmem>>, vector<1x32xf32>
    %28 = arith.addf %25, %27 : vector<1x32xf32>
    %c1_12 = arith.constant 1 : index
    %c0_13 = arith.constant 0 : index
    %29 = vector.load %arg7[%c1_12, %c0_13] : memref<8x32xf32, #tpu.memory_space<vmem>>, vector<1x32xf32>
    tpu.vector_store %arg7[%c1_12, %c0_13], %28 {strides = array<i32>} : memref<8x32xf32, #tpu.memory_space<vmem>>, vector<1x32xf32>,
    %30 = arith.index_cast %arg0 : i32 to index
    %c2 = arith.constant 2 : index
    %31 = memref.load %arg1[%30, %c2] : memref<2x8xi32, #tpu.memory_space<smem>>
    %32 = arith.index_cast %arg0 : i32 to index
    %c2_14 = arith.constant 2 : index
    %33 = memref.load %arg2[%32, %c2_14] : memref<2x8xi32, #tpu.memory_space<smem>>
    %34 = arith.index_cast %31 : i32 to index
    %c0_15 = arith.constant 0 : index
    %35 = vector.load %arg4[%34, %c0_15] : memref<10x32xf32, #tpu.memory_space<vmem>>, vector<1x32xf32>
    %36 = arith.index_cast %33 : i32 to index
    %c0_16 = arith.constant 0 : index
    %37 = vector.load %arg5[%36, %c0_16] : memref<12x32xf32, #tpu.memory_space<vmem>>, vector<1x32xf32>
    %38 = arith.addf %35, %37 : vector<1x32xf32>
    %c2_17 = arith.constant 2 : index
    %c0_18 = arith.constant 0 : index
    %39 = vector.load %arg7[%c2_17, %c0_18] : memref<8x32xf32, #tpu.memory_space<vmem>>, vector<1x32xf32>
    tpu.vector_store %arg7[%c2_17, %c0_18], %38 {strides = array<i32>} : memref<8x32xf32, #tpu.memory_space<vmem>>, vector<1x32xf32>,
    %40 = arith.index_cast %arg0 : i32 to index
    %c3 = arith.constant 3 : index
    %41 = memref.load %arg1[%40, %c3] : memref<2x8xi32, #tpu.memory_space<smem>>
    %42 = arith.index_cast %arg0 : i32 to index
    %c3_19 = arith.constant 3 : index
    %43 = memref.load %arg2[%42, %c3_19] : memref<2x8xi32, #tpu.memory_space<smem>>
    %44 = arith.index_cast %41 : i32 to index
    %c0_20 = arith.constant 0 : index
    %45 = vector.load %arg4[%44, %c0_20] : memref<10x32xf32, #tpu.memory_space<vmem>>, vector<1x32xf32>
    %46 = arith.index_cast %43 : i32 to index
    %c0_21 = arith.constant 0 : index
    %47 = vector.load %arg5[%46, %c0_21] : memref<12x32xf32, #tpu.memory_space<vmem>>, vector<1x32xf32>
    %48 = arith.addf %45, %47 : vector<1x32xf32>
    %c3_22 = arith.constant 3 : index
    %c0_23 = arith.constant 0 : index
    %49 = vector.load %arg7[%c3_22, %c0_23] : memref<8x32xf32, #tpu.memory_space<vmem>>, vector<1x32xf32>
    tpu.vector_store %arg7[%c3_22, %c0_23], %48 {strides = array<i32>} : memref<8x32xf32, #tpu.memory_space<vmem>>, vector<1x32xf32>,
    %50 = arith.index_cast %arg0 : i32 to index
    %c4 = arith.constant 4 : index
    %51 = memref.load %arg1[%50, %c4] : memref<2x8xi32, #tpu.memory_space<smem>>
    %52 = arith.index_cast %arg0 : i32 to index
    %c4_24 = arith.constant 4 : index
    %53 = memref.load %arg2[%52, %c4_24] : memref<2x8xi32, #tpu.memory_space<smem>>
    %54 = arith.index_cast %51 : i32 to index
    %c0_25 = arith.constant 0 : index
    %55 = vector.load %arg4[%54, %c0_25] : memref<10x32xf32, #tpu.memory_space<vmem>>, vector<1x32xf32>
    %56 = arith.index_cast %53 : i32 to index
    %c0_26 = arith.constant 0 : index
    %57 = vector.load %arg5[%56, %c0_26] : memref<12x32xf32, #tpu.memory_space<vmem>>, vector<1x32xf32>
    %58 = arith.addf %55, %57 : vector<1x32xf32>
    %c4_27 = arith.constant 4 : index
    %c0_28 = arith.constant 0 : index
    %59 = vector.load %arg7[%c4_27, %c0_28] : memref<8x32xf32, #tpu.memory_space<vmem>>, vector<1x32xf32>
    tpu.vector_store %arg7[%c4_27, %c0_28], %58 {strides = array<i32>} : memref<8x32xf32, #tpu.memory_space<vmem>>, vector<1x32xf32>,
    %60 = arith.index_cast %arg0 : i32 to index
    %c5 = arith.constant 5 : index
    %61 = memref.load %arg1[%60, %c5] : memref<2x8xi32, #tpu.memory_space<smem>>
    %62 = arith.index_cast %arg0 : i32 to index
    %c5_29 = arith.constant 5 : index
    %63 = memref.load %arg2[%62, %c5_29] : memref<2x8xi32, #tpu.memory_space<smem>>
    %64 = arith.index_cast %61 : i32 to index
    %c0_30 = arith.constant 0 : index
    %65 = vector.load %arg4[%64, %c0_30] : memref<10x32xf32, #tpu.memory_space<vmem>>, vector<1x32xf32>
    %66 = arith.index_cast %63 : i32 to index
    %c0_31 = arith.constant 0 : index
    %67 = vector.load %arg5[%66, %c0_31] : memref<12x32xf32, #tpu.memory_space<vmem>>, vector<1x32xf32>
    %68 = arith.addf %65, %67 : vector<1x32xf32>
    %c5_32 = arith.constant 5 : index
    %c0_33 = arith.constant 0 : index
    %69 = vector.load %arg7[%c5_32, %c0_33] : memref<8x32xf32, #tpu.memory_space<vmem>>, vector<1x32xf32>
    tpu.vector_store %arg7[%c5_32, %c0_33], %68 {strides = array<i32>} : memref<8x32xf32, #tpu.memory_space<vmem>>, vector<1x32xf32>,
    %70 = arith.index_cast %arg0 : i32 to index
    %c6 = arith.constant 6 : index
    %71 = memref.load %arg1[%70, %c6] : memref<2x8xi32, #tpu.memory_space<smem>>
    %72 = arith.index_cast %arg0 : i32 to index
    %c6_34 = arith.constant 6 : index
    %73 = memref.load %arg2[%72, %c6_34] : memref<2x8xi32, #tpu.memory_space<smem>>
    %74 = arith.index_cast %71 : i32 to index
    %c0_35 = arith.constant 0 : index
    %75 = vector.load %arg4[%74, %c0_35] : memref<10x32xf32, #tpu.memory_space<vmem>>, vector<1x32xf32>
    %76 = arith.index_cast %73 : i32 to index
    %c0_36 = arith.constant 0 : index
    %77 = vector.load %arg5[%76, %c0_36] : memref<12x32xf32, #tpu.memory_space<vmem>>, vector<1x32xf32>
    %78 = arith.addf %75, %77 : vector<1x32xf32>
    %c6_37 = arith.constant 6 : index
    %c0_38 = arith.constant 0 : index
    %79 = vector.load %arg7[%c6_37, %c0_38] : memref<8x32xf32, #tpu.memory_space<vmem>>, vector<1x32xf32>
    tpu.vector_store %arg7[%c6_37, %c0_38], %78 {strides = array<i32>} : memref<8x32xf32, #tpu.memory_space<vmem>>, vector<1x32xf32>,
    %80 = arith.index_cast %arg0 : i32 to index
    %c7 = arith.constant 7 : index
    %81 = memref.load %arg1[%80, %c7] : memref<2x8xi32, #tpu.memory_space<smem>>
    %82 = arith.index_cast %arg0 : i32 to index
    %c7_39 = arith.constant 7 : index
    %83 = memref.load %arg2[%82, %c7_39] : memref<2x8xi32, #tpu.memory_space<smem>>
    %84 = arith.index_cast %81 : i32 to index
    %c0_40 = arith.constant 0 : index
    %85 = vector.load %arg4[%84, %c0_40] : memref<10x32xf32, #tpu.memory_space<vmem>>, vector<1x32xf32>
    %86 = arith.index_cast %83 : i32 to index
    %c0_41 = arith.constant 0 : index
    %87 = vector.load %arg5[%86, %c0_41] : memref<12x32xf32, #tpu.memory_space<vmem>>, vector<1x32xf32>
    %88 = arith.addf %85, %87 : vector<1x32xf32>
    %c7_42 = arith.constant 7 : index
    %c0_43 = arith.constant 0 : index
    %89 = vector.load %arg7[%c7_42, %c0_43] : memref<8x32xf32, #tpu.memory_space<vmem>>, vector<1x32xf32>
    tpu.vector_store %arg7[%c7_42, %c0_43], %88 {strides = array<i32>} : memref<8x32xf32, #tpu.memory_space<vmem>>, vector<1x32xf32>,
    %c0_44 = arith.constant 0 : index
    %c0_45 = arith.constant 0 : index
    %90 = vector.load %arg7[%c0_44, %c0_45] : memref<8x32xf32, #tpu.memory_space<vmem>>, vector<8x32xf32>
    %91 = vector.broadcast %9 : vector<1x32xf32> to vector<8x32xf32>
    %92 = arith.mulf %90, %91 : vector<8x32xf32>
    %cst_46 = arith.constant dense<0.000000e+00> : vector<8xf32>
    %93 = vector.multi_reduction <add>, %92, %cst_46 [1] : vector<8x32xf32> to vector<8xf32>
    %94 = vector.shape_cast %93 : vector<8xf32> to vector<1x1x8xf32>
    %c0_47 = arith.constant 0 : index
    %c0_48 = arith.constant 0 : index
    %c0_49 = arith.constant 0 : index
    %95 = vector.load %arg6[%c0_47, %c0_48, %c0_49] : memref<1x1x8xf32, #tpu.memory_space<vmem>>, vector<1x1x8xf32>
    tpu.vector_store %arg6[%c0_47, %c0_48, %c0_49], %94 {strides = array<i32>} : memref<1x1x8xf32, #tpu.memory_space<vmem>>, vector<1x1x8xf32>,
    return
  }
  func.func @transform_0(%arg0: i32, %arg1: memref<2x8xi32, #tpu.memory_space<smem>>, %arg2: memref<2x8xi32, #tpu.memory_space<smem>>) -> (i32, i32, i32) {
    %c0_i32 = arith.constant 0 : i32
    %c0_i32_0 = arith.constant 0 : i32
    %c0_i32_1 = arith.constant 0 : i32
    return %arg0, %c0_i32, %c0_i32_0 : i32, i32, i32
  }
  func.func @transform_1(%arg0: i32, %arg1: memref<2x8xi32, #tpu.memory_space<smem>>, %arg2: memref<2x8xi32, #tpu.memory_space<smem>>) -> (i32, i32) {
    %c0_i32 = arith.constant 0 : i32
    %c0_i32_0 = arith.constant 0 : i32
    %c0_i32_1 = arith.constant 0 : i32
    return %c0_i32, %c0_i32_0 : i32, i32
  }
  func.func @transform_2(%arg0: i32, %arg1: memref<2x8xi32, #tpu.memory_space<smem>>, %arg2: memref<2x8xi32, #tpu.memory_space<smem>>) -> (i32, i32) {
    %c0_i32 = arith.constant 0 : i32
    %c0_i32_0 = arith.constant 0 : i32
    %c0_i32_1 = arith.constant 0 : i32
    return %c0_i32, %c0_i32_0 : i32, i32
  }
  func.func @transform_3(%arg0: i32, %arg1: memref<2x8xi32, #tpu.memory_space<smem>>, %arg2: memref<2x8xi32, #tpu.memory_space<smem>>) -> (i32, i32, i32) {
    %c0_i32 = arith.constant 0 : i32
    %c0_i32_0 = arith.constant 0 : i32
    %c0_i32_1 = arith.constant 0 : i32
    return %arg0, %c0_i32, %c0_i32_0 : i32, i32, i32
  }
}

</mosaic_0001>

<bundles_post_ra>
// kernel: tpu_custom_call.1
= control target key start
LH: loop header
LB: loop body
LE: loop exit
PB: predicated region body
PF: predicated region fallthrough
CT: control target
= control target key end

     0   :  { %s891_s0 = inlined_call_operand.hbm [shape: s32[2,8], index: 0, kind: input, shape index: {}]   ;;  %s892_s2 = inlined_call_operand.vmem [shape: f32[2,1,32], index: 2, kind: input, shape index: {}]   ;;  %s893_s3 = inlined_call_operand.hbm [shape: f32[10,32], index: 3, kind: input, shape index: {}]   ;;  %s894_s4 = inlined_call_operand.hbm [shape: f32[12,32], index: 4, kind: input, shape index: {}]   ;;  %s895_s5 = inlined_call_operand.hbm [shape: f32[2,1,8], index: 5, kind: output, shape index: {}]   ;;  %s896_s1 = inlined_call_operand.vmem [shape: s32[2,8], index: 1, kind: input, shape index: {}]  }
   0x1   :  { %900 = sst [smem:[#allocation16_spill]] %s892_s2  ;;  %s486_s20 = scalar_lea.hbm %s891_s0, 32 }
   0x2   :  { %901 = sst [smem:[#allocation17_spill]] %s893_s3  ;;  %p487_p0 = scmp.ne.s32.totalorder %s891_s0, %s486_s20 }
   0x3   :  { %p490_p1 = scmp.lt.u32.totalorder %s486_s20, %s891_s0 }
   0x5   :  { %p492_p2 = pnand %p490_p1, %p487_p0 }
   0x7   :  { %495 = shalt.err (!%p492_p2)  }
   0x8   :  { %s638_s25 = smov [#allocation4]   ;;  %s12_s30 = sshll.u32 %s896_s1, 4  ;;  %s13_s30 = int_to_ptr.vmem [resolvable:$true] %s12_s30 }
   0x9   :  { %11 = dma.hbm_to_smem %s891_s0, 32, %s638_s25, [#allocation3] }
   0xa   :  { %s496_s6 = scalar_lea.vmem %s13_s30, 32  ;;  %p501_p4 = scmp.lt.s32.totalorder %s13_s30, %s13_s30 }
   0xb   :  { %p497_p3 = scmp.ne.s32.totalorder %s13_s30, %s496_s6  ;;  %p502_p5 = scmp.lt.s32.totalorder %s496_s6, %s496_s6 }
   0xd   :  { %p503_p6 = por %p502_p5, %p501_p4 }
   0xf   :  { %p504_p7 = pnand %p503_p6, %p497_p3 }
  0x11   :  { %507 = shalt.err (!%p504_p7)  }
  0x12   :  { %s639_s7 = smov [#allocation5]  }
  0x13   :  { %15 = dma.vmem_to_smem %s13_s30, 32, %s639_s7, [#allocation3] }
  0x14   :  { %608 = dma.done.wait [#allocation3], 64 }
  0x15   :  { %609 = vsyncadd [#allocation3], 4294967232 }
  0x16   :  { %17 = sfence }
  0x17   :  { %18 = vsyncpa [#allocation7], 0 }
  0x18   :  { %19 = vsyncpa [#allocation10], 0 }
  0x19   :  { %20 = vsyncpa [#allocation8], 0 }
  0x1a   :  { %22 = vsyncpa [#allocation8 + $0x1], 0  ;;  %s690_s0 = smov 0   ;;  %s692_s1 = smov 0  }
  0x1b   :  { %s694_s8 = smov 0   ;;  %s696_s9 = smov 0  }
  0x1c LB: > { %s711_s10 = sadd.s32 4294967295, %s636_s9   ;;  %s408_s11 = sadd.s32 4294967294, %s636_s9   ;;  %s636_s9 = sphi %s696_s9, %s918_s9   ;;  %s632_s8 = sphi %s694_s8, %s917_s8   ;;  %s628_s1 = sphi %s692_s1, %s916_s1   ;;  %s624_s0 = sphi %s690_s0, %s915_s0  }
  0x1d   : > { %s715_s12 = sadd.s32 1, %s636_s9   ;;  %s103_s13 = sadd.s32 1, %s632_s8 }
  0x1e   : > { %s100_s14 = ssub.s32 %s636_s9, %s715_s12  ;;  %p113_p8 = scmp.ne.s32.totalorder %s632_s8, %s628_s1 }
  0x1f   : > { %p101_p9 = scmp.eq.s32.totalorder %s100_s14, 0  ;;  %p114_p10 = scmp.eq.s32.totalorder %s711_s10, 1 }
  0x20   : > { %p119_p11 = scmp.ne.s32.totalorder %s628_s1, %s624_s0  ;;  %p120_p12 = scmp.eq.s32.totalorder %s408_s11, 1 }
  0x21   : > { %s726_s15 = scalar_select %p101_p9, %s632_s8, %s103_s13  }
  0x22   : > { %p728_p13 = por %p114_p10, %p113_p8  ;;  %p732_p0 = por %p120_p12, %p119_p11 }
  0x23   : > { %p409_p1 = scmp.ge.s32.totalorder %s636_s9, 1  ;;  %p127_p2 = scmp.lt.s32.totalorder %s636_s9, 3 }
  0x24   : > { %s902_s16 = scalar_select %p728_p13, 1, 0 }
  0x25   : > { %s903_s17 = scalar_select %p732_p0, 1, 0 }
  0x26   : > { %p897_p3 = scmp.eq.s32.totalorder %s711_s10, 0  ;;  %p739_p4 = pnand %p409_p1, %p127_p2 }
  0x27   : > { %s640_s19 = smov [#allocation6]   ;;  %s641_s22 = smov [#allocation9]  }
  0x28   : > { %s904_s18 = scalar_select %p739_p4, 1, 0 }
  0x29   : > { %s139_s20 = sshll.u32 %s640_s19, 4  ;;  %p430_p5 = pneg %p739_p4  ;;  %s140_s20 = int_to_ptr.vmem [resolvable:$true] %s139_s20 }
  0x2a   : > { %s152_s23 = sshll.u32 %s641_s22, 4  ;;  %s906_s3 = sld [smem:[#allocation17_spill]]  ;;  %s751_s23 = int_to_ptr.vmem [resolvable:$true] %s152_s23 }
  0x2b   : > { %p747_p6 = pnand %p897_p3, %p430_p5 }
  0x2d   : > { %p510_p8 = pneg %p747_p6 }
  0x30   : > { %s508_s26 = scalar_lea.hbm %s906_s3, 256 }
  0x31   : > { %p509_p7 = scmp.ne.s32.totalorder %s906_s3, %s508_s26  ;;  %p515_p11 = scmp.lt.u32.totalorder %s508_s26, %s906_s3 }
  0x33   : > { %p511_p9 = pnand %p510_p8, %p509_p7 }
  0x35   : > { %p512_p10 = pneg %p511_p9 }
  0x37   : > { %p517_p12 = pnand %p515_p11, %p512_p10 }
  0x39   : > { %520 = shalt.err (!%p517_p12)
}
  0x3a   : > { %s521_s6 = scalar_lea.vmem %s140_s20, 256  ;;  %p529_p3 = scmp.lt.s32.totalorder %s140_s20, %s140_s20 }
  0x3b   : > { %p522_p1 = scmp.ne.s32.totalorder %s140_s20, %s521_s6  ;;  %p530_p0 = scmp.lt.s32.totalorder %s521_s6, %s521_s6 }
  0x3d   : > { %p524_p2 = pnand %p522_p1, %p510_p8  ;;  %p531_p13 = por %p530_p0, %p529_p3 }
  0x3f   : > { %p525_p5 = pneg %p524_p2 }
  0x41   : > { %p532_p4 = pnand %p531_p13, %p525_p5 }
  0x43   : > { %535 = shalt.err (!%p532_p4)
}
  0x44   : > { %s642_s7 = smov 128   ;;  %s643_s11 = smov 8  }
  0x45   : > { %433 = dma.hbm_to_vmem [thread:$0]  (!%p747_p6), %s906_s3, 256, %s140_s20, [#allocation7], %s642_s7, %s642_s7, %s643_s11  }
  0x46   : > { %s536_s24 = scalar_lea.hbm %s894_s4, 256 }
  0x47   : > { %p537_p7 = scmp.ne.s32.totalorder %s894_s4, %s536_s24  ;;  %p543_p3 = scmp.lt.u32.totalorder %s536_s24, %s894_s4 }
  0x49   : > { %p539_p13 = pnand %p537_p7, %p510_p8 }
  0x4b   : > { %p540_p0 = pneg %p539_p13 }
  0x4d   : > { %p545_p4 = pnand %p543_p3, %p540_p0 }
  0x4f   : > { %548 = shalt.err (!%p545_p4)
}
  0x50   : > { %s549_s20 = scalar_lea.vmem %s751_s23, 256  ;;  %p557_p12 = scmp.lt.s32.totalorder %s751_s23, %s751_s23 }
  0x51   : > { %p550_p9 = scmp.ne.s32.totalorder %s751_s23, %s549_s20  ;;  %p558_p1 = scmp.lt.s32.totalorder %s549_s20, %s549_s20 }
  0x53   : > { %p552_p10 = pnand %p550_p9, %p510_p8  ;;  %p559_p2 = por %p558_p1, %p557_p12 }
  0x55   : > { %p553_p11 = pneg %p552_p10 }
  0x57   : > { %p560_p5 = pnand %p559_p2, %p553_p11 }
  0x59   : > { %563 = shalt.err (!%p560_p5)
}
  0x5a   : > { %436 = dma.hbm_to_vmem [thread:$0]  (!%p747_p6), %s894_s4, 256, %s751_s23, [#allocation10], %s642_s7, %s642_s7, %s643_s11  }
  0x5b   : > { %p907_p7 = scmp.ne.s32.totalorder %s904_s18, 0 }
  0x5c   : > { %p908_p13 = scmp.eq.s32.totalorder (!%p907_p7), %s711_s10, 0 }
  0x5d   : > { %174 = sbr.rel (%p907_p7) target bundleno = 436 (0x1b4), region = 32 }
  0x64   : > { %611 = dma.done.wait (%p908_p13), [#allocation7], 256   ;;  %p909_p8 = pmov %p908_p13 }
  0x66   : > { %613 = vsyncadd (%p909_p8), [#allocation7], 4294967040  ;;  %p910_p0 = pmov %p909_p8 }
  0x68   : > { %615 = dma.done.wait (%p910_p0), [#allocation10], 256   ;;  %p911_p3 = pmov %p910_p0 }
  0x69   : > { %p199_p4 = scmp.lt.s32.totalorder %s711_s10, 1  ;;  %s912_s2 = sld [smem:[#allocation16_spill]]  ;;  %vm204_vm0 = vcmask 253952   ;;  %v285_v18 = vlaneseq  ;;  %vm291_vm1 = vcmask 261120   ;;  %vm303_vm2 = vcmask 57344  }
  0x6a   : > { %617 = vsyncadd (%p911_p3), [#allocation10], 4294967040  ;;  %s821_s7 = sshll.u32 %s711_s10, 7  ;;  %p913_p9 = scmp.ne.s32.totalorder %s902_s16, 0 }
  0x6b   : > { %s200_s21 = scalar_select %p199_p4, %s711_s10, 1  ;;  %v286_v25 = vshrl.u32 %v285_v18, 7  ;;  %v297_v26 = vand.u32 127, %v285_v18 }
  0x6c   : > { %s220_s11 = sadd.s32 1, %s821_s7  ;;  %s229_s13 = sadd.s32 2, %s821_s7 }
  0x6d   : > { %s212_s14 = sld [smem:[#allocation4 + %s821_s7]]  ;;  %s238_s27 = sadd.s32 3, %s821_s7  ;;  %v300_v30 = vsub.s32 %v297_v26, %v286_v25  ;;  %v287_v33 = vsub.s32 0, %v286_v25 }
  0x6e   : > { %s213_s19 = sld [smem:[#allocation5 + %s821_s7]]  ;;  %s247_s28 = sadd.s32 4, %s821_s7 }
  0x6f   : > { %s201_s6 = scalar_lea.vmem %s912_s2, %s200_s21  ;;  %s221_s22 = sld [smem:[#allocation4 + %s220_s11]] }
  0x70   : > { %v815_v0 = vld [vmem:[%s201_s6] sm:$0x1]  ;;  %s222_s24 = sld [smem:[#allocation5 + %s220_s11]]  ;;  %s265_s3 = sadd.s32 6, %s821_s7 }
  0x71   : > { %v203_v1 = vmul.f32 %v815_v0, %v815_v0  ;;  %s230_s25 = sld [smem:[#allocation4 + %s229_s13]] }
  0x72   : > { %s231_s26 = sld [smem:[#allocation5 + %s229_s13]] }
  0x73   : > { %v205_v2 = vsel %vm204_vm0, %v203_v1, 0.0  ;;  %s239_s20 = sld [smem:[#allocation4 + %s238_s27]]  ;;  %s214_s23 = scalar_lea.vmem [#allocation6], %s212_s14 }
  0x74   : > { %206 = vadd.xlane.f32.xlu0 %v205_v2  ;;  %s240_s29 = sld [smem:[#allocation5 + %s238_s27]]  ;;  %v215_v3 = vld [vmem:[%s214_s23] sm:$0x1]  ;;  %s216_s18 = scalar_lea.vmem [#allocation9], %s213_s19 }
  0x75   : > { %s248_s30 = sld [smem:[#allocation4 + %s247_s28]]  ;;  %v217_v4 = vld [vmem:[%s216_s18] sm:$0x1]  ;;  %s223_s6 = scalar_lea.vmem [#allocation6], %s221_s22 }
  0x76   : > { %s829_s21 = sld [smem:[#allocation5 + %s247_s28]]  ;;  %v218_v5 = vadd.f32 %v217_v4, %v215_v3  ;;  %v224_v6 = vld [vmem:[%s223_s6] sm:$0x1]  ;;  %s225_s2 = scalar_lea.vmem [#allocation9], %s222_s24 }
  0x77   : > { %v226_v7 = vld [vmem:[%s225_s2] sm:$0x1]  ;;  %s232_s11 = scalar_lea.vmem [#allocation6], %s230_s25  ;;  %s256_s27 = sadd.s32 5, %s821_s7 }
  0x78   : > { %v227_v8 = vadd.f32 %v226_v7, %v224_v6  ;;  %v233_v9 = vld [vmem:[%s232_s11] sm:$0x1]  ;;  %s234_s13 = scalar_lea.vmem [#allocation9], %s231_s26  ;;  %219 = vst.msk [vmem:[#allocation2] sm:$0x1] %vm204_vm0, %v218_v5  ;;  %s257_s24 = sld [smem:[#allocation4 + %s256_s27]] }
  0x79   : > { %v235_v10 = vld [vmem:[%s234_s13] sm:$0x1]  ;;  %s241_s14 = scalar_lea.vmem [#allocation6], %s239_s20  ;;  %s258_s25 = sld [smem:[#allocation5 + %s256_s27]] }
  0x7a   : > { %v236_v11 = vadd.f32 %v235_v10, %v233_v9  ;;  %228 = vst.msk [vmem:[#allocation2 + $0x1] sm:$0x1] %vm204_vm0, %v227_v8  ;;  %v242_v12 = vld [vmem:[%s241_s14] sm:$0x1]  ;;  %s243_s19 = scalar_lea.vmem [#allocation9], %s240_s29  ;;  %s266_s26 = sld [smem:[#allocation4 + %s265_s3]] }
  0x7b   : > { %v244_v13 = vld [vmem:[%s243_s19] sm:$0x1]  ;;  %s250_s2 = scalar_lea.vmem [#allocation6], %s248_s30  ;;  %s267_s28 = sld [smem:[#allocation5 + %s265_s3]] }
  0x7c   : > { %237 = vst.msk [vmem:[#allocation2 + $0x2] sm:$0x1] %vm204_vm0, %v236_v11  ;;  %v245_v14 = vadd.f32 %v244_v13, %v242_v12  ;;  %v251_v15 = vld [vmem:[%s250_s2] sm:$0x1]  ;;  %s252_s22 = scalar_lea.vmem [#allocation9], %s829_s21  ;;  %s274_s23 = sadd.s32 7, %s821_s7 }
  0x7d   : > { %v253_v16 = vld [vmem:[%s252_s22] sm:$0x1]  ;;  %s275_s20 = sld [smem:[#allocation4 + %s274_s23]]  ;;  %s197_s11 = sand.u32 1, %s628_s1  }
  0x7e   : > { %v254_v17 = vadd.f32 %v253_v16, %v251_v15  ;;  %246 = vst.msk [vmem:[#allocation2 + $0x3] sm:$0x1] %vm204_vm0, %v245_v14  ;;  %s276_s29 = sld [smem:[#allocation5 + %s274_s23]]  ;;  %s259_s18 = scalar_lea.vmem [#allocation6], %s257_s24 }
  0x7f   : > { %v260_v19 = vld [vmem:[%s259_s18] sm:$0x1]  ;;  %s261_s6 = scalar_lea.vmem [#allocation9], %s258_s25  ;;  %s417_s13 = sshll.u32 %s711_s10, 4 }
  0x80   : > { %255 = vst.msk [vmem:[#allocation2 + $0x4] sm:$0x1] %vm204_vm0, %v254_v17  ;;  %v262_v20 = vld [vmem:[%s261_s6] sm:$0x1]  ;;  %s268_s30 = scalar_lea.vmem [#allocation6], %s266_s26  ;;  %s198_s27 = scalar_lea.vmem [#allocation11], %s197_s11 }
  0x81   : > { %v263_v21 = vadd.f32 %v262_v20, %v260_v19  ;;  %v269_v22 = vld [vmem:[%s268_s30] sm:$0x1]  ;;  %s270_s21 = scalar_lea.vmem [#allocation9], %s267_s28  ;;  %s318_s14 = sshll.u32 %s198_s27, 4  ;;  %s851_s14 = int_to_ptr.vmem [resolvable:$true] %s318_s14 }
  0x82   : > { %v271_v23 = vld [vmem:[%s270_s21] sm:$0x1]  ;;  %s849_s22 = scalar_lea.hbm %s895_s5, %s417_s13  ;;  %s306_s24 = scalar_lea.sflag [#allocation8], %s197_s11 }
  0x83   : > { %v272_v24 = vadd.f32 %v271_v23, %v269_v22  ;;  %264 = vst.msk [vmem:[#allocation2 + $0x5] sm:$0x1] %vm204_vm0, %v263_v21  ;;  %s277_s3 = scalar_lea.vmem [#allocation6], %s275_s20  ;;  %s564_s25 = scalar_lea.vmem %s851_s14, 16 }
  0x84   : > { %v278_v27 = vld [vmem:[%s277_s3] sm:$0x1]  ;;  %s279_s7 = scalar_lea.vmem [#allocation9], %s276_s29  ;;  %p565_p6 = scmp.ne.s32.totalorder %s851_s14, %s564_s25 }
  0x85   : > { %v280_v28 = vld [vmem:[%s279_s7] sm:$0x1]  ;;  %273 = vst.msk [vmem:[#allocation2 + $0x6] sm:$0x1] %vm204_vm0, %v272_v24  ;;  %s644_s10 = smov [#allocation11]  }
  0x86   : > { %v281_v29 = vadd.f32 %v280_v28, %v278_v27  ;;  %p566_p10 = pnand %p565_p6, %p913_p9  ;;  %s568_s26 = sshll.u32 %s644_s10, 4  ;;  %s569_s26 = int_to_ptr.vmem [resolvable:$false] %s568_s26 }
  0x87   : > { %s570_s28 = scalar_lea.vmem %s569_s26, 32  ;;  %p571_p12 = scmp.lt.s32.totalorder %s851_s14, %s569_s26 }
  0x88   : > { %282 = vst.msk [vmem:[#allocation2 + $0x7] sm:$0x1] %vm204_vm0, %v281_v29  ;;  %p567_p11 = pneg %p566_p10  ;;  %p572_p1 = scmp.lt.s32.totalorder %s570_s28, %s564_s25 }
  0x8a   : > { %p573_p2 = por %p572_p1, %p571_p12 }
  0x8c   : > { %p574_p5 = pnand %p573_p2, %p567_p11 }
  0x8f   : > { %v283_v36 = vld [vmem:[#allocation2] sm:$0xff] }
 0x101   : > { %v207_v31 = vpop.xlane.xlu0 %206 }
 0x102   : > { %v208_v32 = vadd.f32 1e-12, %v207_v31 }
 0x104   : > { %484 = vrsqrt.f32 %v208_v32 }
 0x10e   : > { %v485_v34 = vpop.eup %484 }
 0x10f   : > { %v210_v35 = vmul.f32 %v485_v34, %v815_v0 }
 0x111   : > { %v288_v37 = vrot.slane %v210_v35, %v287_v33 }
 0x113   : > { %v290_v38 = vmul.f32 %v288_v37, %v283_v36 }
 0x115   : > { %v292_v39 = vsel %vm291_vm1, %v290_v38, 0.0 }
 0x116   : > { %293 = vadd.xlane.f32.xlu0 %v292_v39 }
 0x1a3   : > { %v294_v40 = vpop.xlane.xlu0 %293 }
 0x1a4   : > { %v301_v41 = vrot.slane %v294_v40, %v300_v30 }
 0x1a6   : > { %304 = vst.msk [vmem:[%s198_s27] sm:$0x1] %vm303_vm2, %v301_v41 }
 0x1a7   : > { %577 = shalt.err (!%p574_p5)
}
 0x1a8   : > { %s578_s23 = scalar_lea.hbm %s849_s22, 16  ;;  %s582_s18 = scalar_lea.hbm %s895_s5, 32 }
 0x1a9   : > { %p579_p7 = scmp.ne.s32.totalorder %s849_s22, %s578_s23  ;;  %p583_p0 = scmp.lt.u32.totalorder %s849_s22, %s895_s5 }
 0x1aa   : > { %p584_p3 = scmp.lt.u32.totalorder %s582_s18, %s578_s23  ;;  %p586_p6 = scmp.lt.u32.totalorder %s578_s23, %s849_s22 }
 0x1ab   : > { %p580_p13 = pnand %p579_p7, %p913_p9 }
 0x1ac   : > { %p585_p4 = por %p584_p3, %p583_p0 }
 0x1ad   : > { %p581_p8 = pneg %p580_p13 }
 0x1ae   : > { %p587_p10 = por %p586_p6, %p585_p4 }
 0x1b0   : > { %p588_p11 = pnand %p587_p10, %p581_p8 }
 0x1b2   : > { %591 = shalt.err (!%p588_p11)
}
 0x1b3   : > { %428 = dma.vmem_to_hbm [thread:$0]  (%p913_p9), %s851_s14, 16, %s849_s22, %s306_s24  }
 0x1b4 PF: > { %p445_p12 = scmp.ge.s32.totalorder %s636_s9, 2  ;;  %s330_s21 = sand.u32 1, %s624_s0  }
 0x1b5   : > { %p914_p1 = scmp.ne.s32.totalorder %s903_s17, 0  ;;  %s331_s3 = scalar_lea.sflag [#allocation8], %s330_s21 }
 0x1b7   : > { %p438_p2 = pnand %p445_p12, %p914_p1 }
 0x1b9   : > { %619 = dma.done.wait (!%p438_p2), %s331_s3, 16  }
 0x1ba   : > { %621 = vsyncadd (!%p438_p2), %s331_s3, 4294967280  ;;  %p25_p5 = scmp.ge.s32.totalorder %s715_s12, 4   ;;  %s915_s0 = smov %s628_s1 }
 0x1bb   : > { %s916_s1 = smov %s632_s8  ;;  %s917_s8 = smov %s726_s15 }
 0x1bc   : > { %s918_s9 = smov %s715_s12  ;;  %27 = sbr.rel (!%p25_p5) target bundleno = 28 (0x1c), region = 92 }
 0x1c3   :  { %335 = vsyncpa [#allocation7], 1 }
 0x1c4   :  { %337 = vsyncpa [#allocation7 + $0x1], 1 }
 0x1c5   :  { %338 = vsyncpa [#allocation10], 1 }
 0x1c6   :  { %339 = vsyncpa [#allocation8], 1 }
 0x1c7   :  { %341 = vsyncpa [#allocation8 + $0x1], 1 }

</bundles_post_ra>
